<compile_context>
chip_gen: v7x
topology: tpu7x:2x2x1
jax: 0.10.0
libtpu: 0.0.40
codegen_flags: <defaults>
</compile_context>

<pallas_src>
import math

import jax
import jax.numpy as jnp
import numpy as np
from jax import lax
from jax.experimental import pallas as pl
from jax.experimental.pallas import tpu as pltpu


# ----------------------------------------------------------------------------
# Pallas kernel
# ----------------------------------------------------------------------------
def data_embedding_kernel(x_ref, xm_ref, w_ref, tab_ref, pe_ref, o_ref):
    # x_ref:   (1, TL, 3C)  pre-shifted values [x[t-1] | x[t] | x[t+1]]
    # xm_ref:  (1, TL, 4)   int32 time marks with table offsets pre-added
    # w_ref:   (3C, D)      stacked conv taps
    # tab_ref: (NT, D)      stacked month/day/weekday/hour sinusoid tables
    # pe_ref:  (TL, D)      positional-embedding slice for this L tile
    # o_ref:   (1, TL, D)
    x = x_ref[0]                                                     # (TL, 3C)

    # value embedding: circular conv1d(k=3) fused into a single MXU matmul
    y = jnp.dot(x, w_ref[...], preferred_element_type=jnp.float32)   # (TL, D)

    # temporal embedding: 4 table lookups expressed as one multi-hot matmul
    # (offsets make each mark column hit a disjoint row range of tab_ref)
    xm = xm_ref[0]                                                   # (TL, 4)
    n_tab = tab_ref.shape[0]
    iota = lax.broadcasted_iota(jnp.int32, (xm.shape[0], n_tab), 1)  # (TL, NT)
    hot = ((iota == xm[:, 0:1]) | (iota == xm[:, 1:2]) |
           (iota == xm[:, 2:3]) | (iota == xm[:, 3:4])).astype(jnp.float32)
    y = y + jnp.dot(hot, tab_ref[...], preferred_element_type=jnp.float32)

    # positional embedding
    y = y + pe_ref[...]

    o_ref[0] = y.astype(o_ref.dtype)


def _pick_l_tile(L, target=512):
    """Largest tile of L that is <= target and satisfies the (8,128) rule."""
    if L <= target:
        return L
    for tl in range(target, 7, -1):
        if L % tl == 0 and tl % 8 == 0:
            return tl
    return L


def data_embedding_pallas(x, x_mark, conv_w, tables, pe, *, out_dtype=jnp.float32):
    """DataEmbedding forward (embed_type='fixed', freq='h', dropout = identity).

    x:       (B, L, C)  float32 values
    x_mark:  (B, L, 4)  int time marks, columns = [month, day, weekday, hour]
    conv_w:  (D, C, 3)  Conv1d weight (out_ch, in_ch, kernel)
    tables:  dict with 'month'(13,D), 'day'(32,D), 'weekday'(7,D), 'hour'(24,D)
    pe:      (L, D)     positional sinusoid table slice
    """
    B, L, C = x.shape
    D = conv_w.shape[0]

    # ---- wrapper-side glue (cheap relative to the (B, L, D) output) --------
    # Circular shifts folded into the channel dim so the wrap never crosses a
    # block boundary and the kernel does a single matmul.
    x_cat = jnp.concatenate(
        [jnp.roll(x, 1, axis=1), x, jnp.roll(x, -1, axis=1)], axis=-1)       # (B, L, 3C)
    # Matching stacked weight: rows [tap(-1) | tap(0) | tap(+1)], each (C, D).
    w_cat = jnp.concatenate(
        [conv_w[:, :, 0].T, conv_w[:, :, 1].T, conv_w[:, :, 2].T], axis=0)   # (3C, D)
    # Stacked temporal tables + per-column index offsets.
    tab_cat = jnp.concatenate(
        [tables["month"], tables["day"], tables["weekday"], tables["hour"]], axis=0)
    sizes = [tables["month"].shape[0], tables["day"].shape[0],
             tables["weekday"].shape[0], tables["hour"].shape[0]]
    offs = np.cumsum([0] + sizes[:-1]).astype(np.int32)                      # [0,13,45,52]
    xm_off = x_mark.astype(jnp.int32) + jnp.asarray(offs)[None, None, :]     # (B, L, 4)

    tl = _pick_l_tile(L)
    n_tab = tab_cat.shape[0]
    # L axis outer, batch inner: pe / weight / table blocks stay resident
    # across the inner batch steps (constant block index => no re-DMA).
    grid = (L // tl, B)

    return pl.pallas_call(
        data_embedding_kernel,
        out_shape=jax.ShapeDtypeStruct((B, L, D), out_dtype),
        grid=grid,
        in_specs=[
            pl.BlockSpec((1, tl, 3 * C), lambda l, b: (b, l, 0)),
            pl.BlockSpec((1, tl, 4), lambda l, b: (b, l, 0)),
            pl.BlockSpec((3 * C, D), lambda l, b: (0, 0)),
            pl.BlockSpec((n_tab, D), lambda l, b: (0, 0)),
            pl.BlockSpec((tl, D), lambda l, b: (l, 0)),
        ],
        out_specs=pl.BlockSpec((1, tl, D), lambda l, b: (b, l, 0)),
        compiler_params=pltpu.CompilerParams(
            dimension_semantics=("parallel", "parallel")),
    )(x_cat, xm_off, w_cat, tab_cat, pe)


# ----------------------------------------------------------------------------
# Parameter / table construction (matches the PyTorch __init__)
# ----------------------------------------------------------------------------
def sinusoid_table(n_rows, d_model):
    pos = np.arange(n_rows, dtype=np.float32)[:, None]
    div = np.exp(np.arange(0, d_model, 2, dtype=np.float32)
                 * -(math.log(10000.0) / d_model))
    tab = np.zeros((n_rows, d_model), dtype=np.float32)
    tab[:, 0::2] = np.sin(pos * div)
    tab[:, 1::2] = np.cos(pos * div)
    return jnp.asarray(tab)


def make_conv_weight(key, d_model, c_in):
    # kaiming_normal_(mode='fan_in', nonlinearity='leaky_relu', a=0)
    fan_in = c_in * 3
    std = math.sqrt(2.0) / math.sqrt(fan_in)
    return std * jax.random.normal(key, (d_model, c_in, 3), dtype=jnp.float32)


# ----------------------------------------------------------------------------
# Pure-JAX reference (ground-truth semantics: conv + gathers + pe)
# ----------------------------------------------------------------------------
def data_embedding_ref(x, x_mark, conv_w, tables, pe):
    x_prev = jnp.roll(x, 1, axis=1)
    x_next = jnp.roll(x, -1, axis=1)
    y = (jnp.einsum("blc,dc->bld", x_prev, conv_w[:, :, 0])
         + jnp.einsum("blc,dc->bld", x, conv_w[:, :, 1])
         + jnp.einsum("blc,dc->bld", x_next, conv_w[:, :, 2]))
    xm = x_mark.astype(jnp.int32)
    temporal = (tables["hour"][xm[..., 3]] + tables["weekday"][xm[..., 2]]
                + tables["day"][xm[..., 1]] + tables["month"][xm[..., 0]])
    return y + temporal + pe[None]


if __name__ == "__main__":
    B, L, C, D = 2, 8, 4, 32  # batch, seq_len, c_in, d_model (tiny demo shapes)

    key = jax.random.PRNGKey(0)
    k_x, k_w, k_m0, k_m1, k_m2, k_m3 = jax.random.split(key, 6)

    def bf16_roundtrip(a):
        # Round matmul operands to bf16-representable f32 so the correctness
        # check is exact regardless of whether this TPU generation's MXU f32
        # path internally demotes operands to bf16 (accumulation stays f32).
        return a.astype(jnp.bfloat16).astype(jnp.float32)

    x = bf16_roundtrip(jax.random.normal(k_x, (B, L, C), dtype=jnp.float32))
    # x_mark columns: [month, day, weekday, hour]  (freq='h')
    x_mark = jnp.stack(
        [
            jax.random.randint(k_m0, (B, L), 0, 13),
            jax.random.randint(k_m1, (B, L), 0, 32),
            jax.random.randint(k_m2, (B, L), 0, 7),
            jax.random.randint(k_m3, (B, L), 0, 24),
        ],
        axis=-1,
    ).astype(jnp.int32)

    conv_w = bf16_roundtrip(make_conv_weight(k_w, D, C))          # (D, C, 3)
    tables = {
        "month": bf16_roundtrip(sinusoid_table(13, D)),
        "day": bf16_roundtrip(sinusoid_table(32, D)),
        "weekday": bf16_roundtrip(sinusoid_table(7, D)),
        "hour": bf16_roundtrip(sinusoid_table(24, D)),
    }
    pe = sinusoid_table(5000, D)[:L]                              # pe[:, :L]

    out = data_embedding_pallas(x, x_mark, conv_w, tables, pe)
    out = jax.block_until_ready(out)

    ref = data_embedding_ref(x, x_mark, conv_w, tables, pe)
    np.testing.assert_allclose(np.asarray(out), np.asarray(ref),
                               rtol=1e-4, atol=1e-4)

    print("KERNEL_OK")
</pallas_src>

<mosaic_0001>
module attributes {stable_mosaic.version = 11 : i64} {
  func.func @data_embedding_kernel(%arg0: i32, %arg1: i32, %arg2: memref<1x8x12xf32, #tpu.memory_space<vmem>>, %arg3: memref<1x8x4xi32, #tpu.memory_space<vmem>>, %arg4: memref<12x32xf32, #tpu.memory_space<vmem>>, %arg5: memref<76x32xf32, #tpu.memory_space<vmem>>, %arg6: memref<8x32xf32, #tpu.memory_space<vmem>>, %arg7: memref<1x8x32xf32, #tpu.memory_space<vmem>>) attributes {dimension_semantics = [#tpu.dimension_semantics<parallel>, #tpu.dimension_semantics<parallel>], iteration_bounds = array<i64: 1, 2>, scalar_prefetch = 0 : i64, scratch_operands = 0 : i64, tpu.core_type = #tpu.core_type<tc>, window_params = [{transform_indices = @transform_0, window_bounds = array<i64: 1, 8, 12>}, {transform_indices = @transform_1, window_bounds = array<i64: 1, 8, 4>}, {pipeline_mode = #tpu.pipeline_mode<synchronous>, transform_indices = @transform_2, window_bounds = array<i64: 12, 32>}, {pipeline_mode = #tpu.pipeline_mode<synchronous>, transform_indices = @transform_3, window_bounds = array<i64: 76, 32>}, {transform_indices = @transform_4, window_bounds = array<i64: 8, 32>}, {transform_indices = @transform_5, window_bounds = array<i64: 1, 8, 32>}]} {
    %c0 = arith.constant 0 : index
    %c0_0 = arith.constant 0 : index
    %c0_1 = arith.constant 0 : index
    %0 = vector.load %arg2[%c0, %c0_0, %c0_1] : memref<1x8x12xf32, #tpu.memory_space<vmem>>, vector<1x8x12xf32>
    %1 = vector.shape_cast %0 : vector<1x8x12xf32> to vector<8x12xf32>
    %c0_2 = arith.constant 0 : index
    %c0_3 = arith.constant 0 : index
    %2 = vector.load %arg4[%c0_2, %c0_3] : memref<12x32xf32, #tpu.memory_space<vmem>>, vector<12x32xf32>
    %cst = arith.constant dense<0.000000e+00> : vector<8x32xf32>
    %3 = tpu.matmul %1, %2, %cst {dimension_numbers = #tpu.dot_dimension_numbers<[1], [0], [0], [1], [0, 0, 1, 1], [], []>} : vector<8x12xf32>, vector<12x32xf32>, vector<8x32xf32> -> vector<8x32xf32>
    %c0_4 = arith.constant 0 : index
    %c0_5 = arith.constant 0 : index
    %c0_6 = arith.constant 0 : index
    %4 = vector.load %arg3[%c0_4, %c0_5, %c0_6] : memref<1x8x4xi32, #tpu.memory_space<vmem>>, vector<1x8x4xi32>
    %5 = vector.shape_cast %4 : vector<1x8x4xi32> to vector<8x4xi32>
    %6 = tpu.iota {dimensions = array<i32: 1>} : vector<8x76xi32>
    %7 = vector.extract_strided_slice %5 {offsets = [0, 0], sizes = [8, 1], strides = [1, 1]} : vector<8x4xi32> to vector<8x1xi32>
    %8 = vector.broadcast %7 : vector<8x1xi32> to vector<8x76xi32>
    %9 = arith.cmpi eq, %6, %8 : vector<8x76xi32>
    %10 = vector.extract_strided_slice %5 {offsets = [0, 1], sizes = [8, 1], strides = [1, 1]} : vector<8x4xi32> to vector<8x1xi32>
    %11 = vector.broadcast %10 : vector<8x1xi32> to vector<8x76xi32>
    %12 = arith.cmpi eq, %6, %11 : vector<8x76xi32>
    %13 = arith.ori %9, %12 : vector<8x76xi1>
    %14 = vector.extract_strided_slice %5 {offsets = [0, 2], sizes = [8, 1], strides = [1, 1]} : vector<8x4xi32> to vector<8x1xi32>
    %15 = vector.broadcast %14 : vector<8x1xi32> to vector<8x76xi32>
    %16 = arith.cmpi eq, %6, %15 : vector<8x76xi32>
    %17 = arith.ori %13, %16 : vector<8x76xi1>
    %18 = vector.extract_strided_slice %5 {offsets = [0, 3], sizes = [8, 1], strides = [1, 1]} : vector<8x4xi32> to vector<8x1xi32>
    %19 = vector.broadcast %18 : vector<8x1xi32> to vector<8x76xi32>
    %20 = arith.cmpi eq, %6, %19 : vector<8x76xi32>
    %21 = arith.ori %17, %20 : vector<8x76xi1>
    %22 = arith.extui %21 : vector<8x76xi1> to vector<8x76xi32>
    %23 = arith.sitofp %22 : vector<8x76xi32> to vector<8x76xf32>
    %c0_7 = arith.constant 0 : index
    %c0_8 = arith.constant 0 : index
    %24 = vector.load %arg5[%c0_7, %c0_8] : memref<76x32xf32, #tpu.memory_space<vmem>>, vector<76x32xf32>
    %cst_9 = arith.constant dense<0.000000e+00> : vector<8x32xf32>
    %25 = tpu.matmul %23, %24, %cst_9 {dimension_numbers = #tpu.dot_dimension_numbers<[1], [0], [0], [1], [0, 0, 1, 1], [], []>} : vector<8x76xf32>, vector<76x32xf32>, vector<8x32xf32> -> vector<8x32xf32>
    %26 = arith.addf %3, %25 : vector<8x32xf32>
    %c0_10 = arith.constant 0 : index
    %c0_11 = arith.constant 0 : index
    %27 = vector.load %arg6[%c0_10, %c0_11] : memref<8x32xf32, #tpu.memory_space<vmem>>, vector<8x32xf32>
    %28 = arith.addf %26, %27 : vector<8x32xf32>
    %c0_12 = arith.constant 0 : index
    %c0_13 = arith.constant 0 : index
    %c0_14 = arith.constant 0 : index
    %29 = vector.load %arg7[%c0_12, %c0_13, %c0_14] : memref<1x8x32xf32, #tpu.memory_space<vmem>>, vector<1x8x32xf32>
    %30 = vector.shape_cast %29 : vector<1x8x32xf32> to vector<8x32xf32>
    %31 = vector.shape_cast %28 : vector<8x32xf32> to vector<1x8x32xf32>
    tpu.vector_store %arg7[%c0_12, %c0_13, %c0_14], %31 {strides = array<i32>} : memref<1x8x32xf32, #tpu.memory_space<vmem>>, vector<1x8x32xf32>,
    return
  }
  func.func @transform_0(%arg0: i32, %arg1: i32) -> (i32, i32, i32) {
    %c0_i32 = arith.constant 0 : i32
    %c0_i32_0 = arith.constant 0 : i32
    return %arg1, %arg0, %c0_i32 : i32, i32, i32
  }
  func.func @transform_1(%arg0: i32, %arg1: i32) -> (i32, i32, i32) {
    %c0_i32 = arith.constant 0 : i32
    %c0_i32_0 = arith.constant 0 : i32
    return %arg1, %arg0, %c0_i32 : i32, i32, i32
  }
  func.func @transform_2(%arg0: i32, %arg1: i32) -> (i32, i32) {
    %c0_i32 = arith.constant 0 : i32
    %c0_i32_0 = arith.constant 0 : i32
    %c0_i32_1 = arith.constant 0 : i32
    return %c0_i32, %c0_i32_0 : i32, i32
  }
  func.func @transform_3(%arg0: i32, %arg1: i32) -> (i32, i32) {
    %c0_i32 = arith.constant 0 : i32
    %c0_i32_0 = arith.constant 0 : i32
    %c0_i32_1 = arith.constant 0 : i32
    return %c0_i32, %c0_i32_0 : i32, i32
  }
  func.func @transform_4(%arg0: i32, %arg1: i32) -> (i32, i32) {
    %c0_i32 = arith.constant 0 : i32
    %c0_i32_0 = arith.constant 0 : i32
    return %arg0, %c0_i32 : i32, i32
  }
  func.func @transform_5(%arg0: i32, %arg1: i32) -> (i32, i32, i32) {
    %c0_i32 = arith.constant 0 : i32
    %c0_i32_0 = arith.constant 0 : i32
    return %arg1, %arg0, %c0_i32 : i32, i32, i32
  }
}

</mosaic_0001>

<bundles_post_ra>
// kernel: tpu_custom_call.1
= control target key start
LH: loop header
LB: loop body
LE: loop exit
PB: predicated region body
PF: predicated region fallthrough
CT: control target
= control target key end

     0   :  { %10 = vsyncpa [#allocation3], 0  ;;  %s1040_s0 = inlined_call_operand.vmem [shape: f32[2,8,12], index: 0, kind: input, shape index: {}]   ;;  %s1041_s1 = inlined_call_operand.vmem [shape: s32[2,8,4], index: 1, kind: input, shape index: {}]   ;;  %s1042_s2 = inlined_call_operand.vmem [shape: f32[12,32], index: 2, kind: input, shape index: {}]   ;;  %s1043_s3 = inlined_call_operand.vmem [shape: f32[76,32], index: 3, kind: input, shape index: {}]   ;;  %s1044_s4 = inlined_call_operand.vmem [shape: f32[8,32], index: 4, kind: input, shape index: {}]   ;;  %s1045_s5 = inlined_call_operand.hbm [shape: f32[2,8,32], index: 5, kind: output, shape index: {}]  }
   0x1   :  { %12 = vsyncpa [#allocation3 + $0x1], 0  ;;  %s871_s18 = smov 0   ;;  %s873_s19 = smov 0  }
   0x2   :  { %s875_s20 = smov 0   ;;  %s877_s21 = smov 0  }
   0x3   :  { %s879_s22 = smov 0   ;;  %s881_s23 = smov 0  }
   0x4 LB: > { %s602_s24 = sadd.s32 4294967295, %s830_s23   ;;  %s603_s25 = sadd.s32 4294967294, %s830_s23   ;;  %s830_s23 = sphi %s881_s23, %s18_s23   ;;  %s826_s22 = sphi %s879_s22, %s1054_s22   ;;  %s822_s21 = sphi %s877_s21, %s1053_s21   ;;  %s818_s20 = sphi %s875_s20, %s1052_s20   ;;  %s814_s19 = sphi %s873_s19, %s1051_s19   ;;  %s810_s18 = sphi %s871_s18, %s1050_s18  }
   0x5   : > { %s27_s26 = sadd.s32 1, %s826_s22  ;;  %s163_s27 = sadd.s32 1, %s818_s20 }
   0x6   : > { %p28_p0 = scmp.ge.s32.totalorder %s27_s26, 2  ;;  %p173_p1 = scmp.ne.s32.totalorder %s818_s20, %s814_s19 }
   0x7   : > { %p174_p2 = scmp.eq.s32.totalorder %s602_s24, 1  ;;  %p179_p3 = scmp.ne.s32.totalorder %s814_s19, %s810_s18 }
   0x8   : > { %s1056_s26 = smov (%p28_p0, %s27_s26), 0  ;;  %p180_p5 = scmp.eq.s32.totalorder %s603_s25, 1 }
   0x9   : > { %p911_p4 = por %p174_p2, %p173_p1  ;;  %s158_s29 = ssub.s32 %s826_s22, %s1056_s26 }
   0xa   : > { %p607_p6 = scmp.ge.s32.totalorder %s830_s23, 1  ;;  %p161_p7 = scmp.eq.s32.totalorder %s158_s29, 0 }
   0xb   : > { %p918_p8 = por %p180_p5, %p179_p3  ;;  %p231_p9 = scmp.lt.s32.totalorder %s830_s23, 3 }
   0xc   : > { %s924_s6 = scalar_select %p161_p7, %s818_s20, %s163_s27  }
   0xd   : > { %p232_p10 = pnand %p607_p6, %p231_p9 }
   0xe   : > { %p272_p11 = scmp.lt.s32.totalorder (!%p232_p10), %s822_s21, 1  ;;  %v317_v0 = vld [vmem:[%s1043_s3] sm:$0xff] (!%p232_p10)  ;;  %v832_v1 = vmov (!%p232_p10), 0   ;;  %v833_v2 = vmov (!%p232_p10), 2   ;;  %v318_v3 = vld [vmem:[%s1043_s3 + $0x8] sm:$0xff] (!%p232_p10)  ;;  %v319_v4 = vld [vmem:[%s1043_s3 + $0x10] sm:$0xff] (!%p232_p10)  ;;  %v294_v27 = vlaneseq (!%p232_p10) }
   0xf   : > { %235 = sbr.rel (%p232_p10) target bundleno = 395 (0x18b), region = 40  ;;  %747 = vset.pattern.permute.xlu0 (!%p232_p10), %v832_v1  ;;  %749 = vset.pattern.permute.xlu1 (!%p232_p10), %v833_v2  ;;  %v320_v5 = vld [vmem:[%s1043_s3 + $0x18] sm:$0xff] (!%p232_p10)  ;;  %v834_v6 = vmov (!%p232_p10), 0.0|0.0   ;;  %v665_v7 = vpack.c.bf16 (!%p232_p10), %v318_v3, %v317_v0  ;;  %v321_v10 = vld [vmem:[%s1043_s3 + $0x20] sm:$0xff] (!%p232_p10)  ;;  %v322_v11 = vld [vmem:[%s1043_s3 + $0x28] sm:$0xff] (!%p232_p10)  ;;  %v835_v17 = vmov (!%p232_p10), 1  }
  0x10   : > { %664 = vmatprep.subr.bf16.mxu0 (!%p232_p10), %v834_v6  ;;  %680 = vmatprep.subr.bf16.mxu1 (!%p232_p10), %v834_v6  ;;  %v668_v8 = vpack.c.bf16 (!%p232_p10), %v320_v5, %v319_v4  ;;  %v671_v12 = vpack.c.bf16 (!%p232_p10), %v322_v11, %v321_v10  ;;  %v323_v13 = vld [vmem:[%s1043_s3 + $0x30] sm:$0xff] (!%p232_p10)  ;;  %v324_v14 = vld [vmem:[%s1043_s3 + $0x38] sm:$0xff] (!%p232_p10)  ;;  %v291_v15 = vld [vmem:[%s1042_s2] sm:$0xff] (!%p232_p10)  ;;  %v836_v18 = vmov (!%p232_p10), 3   ;;  %vm331_vm0 = vcmask (!%p232_p10), 1043456   ;;  %s617_s13 = sshll.u32 (!%p232_p10), %s822_s21, 7 }
  0x11   : > { %666 = vmatpush3.bf16.msra.mxu0 (!%p232_p10), %v665_v7  ;;  %v292_v16 = vld [vmem:[%s1042_s2 + $0x8] sm:$0xf] (!%p232_p10)  ;;  %vm837_vm1 = vmmov (!%p232_p10), 1   ;;  %v674_v21 = vpack.c.bf16 (!%p232_p10), %v324_v14, %v323_v13  ;;  %v325_v22 = vld [vmem:[%s1043_s3 + $0x40] sm:$0xff] (!%p232_p10)  ;;  %vm838_vm3 = vmmov (!%p232_p10), 0   ;;  %v839_v24 = vmov (!%p232_p10), 0.0   ;;  %s993_s27 = scalar_lea.hbm (!%p232_p10), %s1045_s5, %s617_s13 }
  0x12   : > { %667 = vmatprep.subr.bf16.mxu0 (!%p232_p10), %v834_v6  ;;  %v681_v19 = vpack.c.bf16 (!%p232_p10), %v292_v16, %v291_v15  ;;  %vm966_vm2 = vmpackc.low (!%p232_p10), %vm331_vm0, %vm837_vm1  ;;  %v326_v23 = vld [vmem:[%s1043_s3 + $0x48] sm:$0xf] (!%p232_p10)  ;;  %661 = vmatprep.mubr.msk.f32.mxu1 (!%p232_p10), %vm838_vm3, %v839_v24  ;;  %vm405_vm4 = vcmask (!%p232_p10), 97280   ;;  %v295_v30 = vand.u32 (!%p232_p10), 127, %v294_v27  ;;  %vm327_vm11 = vcmask (!%p232_p10), 621568   ;;  %v482_v37 = vld [vmem:[%s1044_s4] sm:$0xff] (!%p232_p10) }
  0x13   : > { %654 = vmatprep.mubr.msk.f32.mxu0 (!%p232_p10), %vm838_vm3, %v839_v24  ;;  %v677_v26 = vpack.c.bf16 (!%p232_p10), %v326_v23, %v325_v22  ;;  %vm484_vm13 = vcmask (!%p232_p10), 261120  }
  0x14   : > { %683 = vmatpush3.bf16.msk.msra.mxu1 (!%p232_p10), %vm966_vm2, %v681_v19 }
  0x15   : > { %669 = vmatpush3.bf16.msra.mxu0 (!%p232_p10), %v668_v8 }
  0x16   : > { %s940_s15 = scalar_select %p272_p11, %s822_s21, 1  ;;  %670 = vmatprep.subr.bf16.mxu0 %v834_v6 }
  0x17   : > { %s840_s21 = smov [#allocation2]  }
  0x18   : > { %s609_s16 = sshll.u32 %s940_s15, 3  ;;  %s269_s15 = sand.u32 1, %s814_s19  }
  0x19   : > { %s285_s25 = scalar_lea.vmem %s1041_s1, %s609_s16  ;;  %672 = vmatpush3.bf16.msra.mxu0 %v671_v12  ;;  %s278_s10 = scalar_lea.vmem %s1040_s0, %s609_s16 }
  0x1a   : > { %v293_v9 = vld [vmem:[%s285_s25] sm:$0xff]  ;;  %673 = vmatprep.subr.bf16.mxu0 %v834_v6  ;;  %s608_s16 = sshll.u32 %s269_s15, 3  ;;  %s487_s29 = scalar_lea.sflag [#allocation3], %s269_s15 }
  0x1b   : > { %297 = vperm.xlu0 %747, %v293_v9   ;;  %306 = vperm.xlu1 %749, %v293_v9   ;;  %v290_v25 = vld [vmem:[%s278_s10] sm:$0xff]  ;;  %s271_s14 = scalar_lea.vmem [#allocation2], %s608_s16  ;;  %s756_s8 = sshll.u32 %s840_s21, 4  ;;  %s757_s8 = int_to_ptr.vmem [resolvable:$false] %s756_s8 }
  0x1c   : > { %662 = vmatmul.mubr.msk.f32.vlgmr.msra.gmra.mrb[0].mxu1 %vm405_vm4, %v290_v25  ;;  %s501_s17 = sshll.u32 %s271_s14, 4  ;;  %s758_s9 = scalar_lea.vmem %s757_s8, 256  ;;  %s995_s17 = int_to_ptr.vmem [resolvable:$true] %s501_s17 }
  0x1d   : > { %675 = vmatpush3.bf16.msra.mxu0 %v674_v21  ;;  %s752_s7 = scalar_lea.vmem %s995_s17, 128  ;;  %p759_p1 = scmp.lt.s32.totalorder %s995_s17, %s757_s8 }
  0x1e   : > { %676 = vmatprep.subr.bf16.mxu0 %v834_v6  ;;  %p753_p12 = scmp.ne.s32.totalorder %s995_s17, %s752_s7  ;;  %p760_p2 = scmp.lt.s32.totalorder %s758_s9, %s752_s7 }
  0x1f   : > { %748 = vset.pattern.permute.xlu0 %v835_v17  ;;  %750 = vset.pattern.permute.xlu1 %v836_v18 }
  0x20   : > { %301 = vperm.xlu0 %748, %v293_v9   ;;  %311 = vperm.xlu1 %750, %v293_v9   ;;  %p754_p13 = pnand %p753_p12, %p911_p4  ;;  %p761_p3 = por %p760_p2, %p759_p1 }
  0x21   : > { %679 = vmatpush3.bf16.msk.msra.mxu0 %vm966_vm2, %v677_v26 }
  0x22   : > { %p755_p0 = pneg %p754_p13 }
  0x24   : > { %751 = vset.pattern.permute.xlu0 %v836_v18  ;;  %p762_p5 = pnand %p761_p3, %p755_p0 }
  0x9a   : > { %v298_v28 = vpop.permute.xlu0 %297  ;;  %v307_v29 = vpop.permute.xlu1 %306 }
  0x9b   : > { %vm299_vm5 = vcmp.eq.s32.totalorder %v295_v30, %v298_v28  ;;  %vm308_vm8 = vcmp.eq.s32.totalorder %v295_v30, %v307_v29 }
  0x9f   : > { %v302_v31 = vpop.permute.xlu0 %301  ;;  %v312_v32 = vpop.permute.xlu1 %311 }
  0xa0   : > { %vm303_vm6 = vcmp.eq.s32.totalorder %v295_v30, %v302_v31  ;;  %vm313_vm7 = vcmp.eq.s32.totalorder %v295_v30, %v312_v32 }
  0xa1   : > { %vm304_vm9 = vmor %vm299_vm5, %vm303_vm6 }
  0xa2   : > { %vm309_vm10 = vmor %vm304_vm9, %vm308_vm8 }
  0xa3   : > { %vm314_vm12 = vmor %vm309_vm10, %vm313_vm7 }
  0xa4   : > { %v611_v33 = vsel %vm314_vm12, 1.0, %v839_v24 }
  0xa5   : > { %655 = vmatmul.mubr.msk.f32.vlgmr.msra.gmra.mrb[0].mxu0 %vm327_vm11, %v611_v33 }
  0xef   : > { %v478_v34 = vpop.f32.mrb[0].mxu1 }
  0xf0   : > { %v663_v35 = vpop.f32.mrb[1].mxu1 }
 0x178   : > { %v401_v36 = vpop.f32.mrb[0].mxu0 }
 0x179   : > { %v479_v38 = vadd.f32 %v478_v34, %v401_v36  ;;  %v656_v39 = vpop.f32.mrb[1].mxu0 }
 0x17b   : > { %v483_v40 = vadd.f32 %v482_v37, %v479_v38 }
 0x17d   : > { %485 = vst.msk [vmem:[%s271_s14] sm:$0xff] %vm484_vm13, %v483_v40 }
 0x17e   : > { %765 = shalt.err (!%p762_p5)
}
 0x17f   : > { %s766_s10 = scalar_lea.hbm %s993_s27, 128  ;;  %s770_s11 = scalar_lea.hbm %s1045_s5, 256 }
 0x180   : > { %p767_p6 = scmp.ne.s32.totalorder %s993_s27, %s766_s10  ;;  %p771_p10 = scmp.lt.u32.totalorder %s993_s27, %s1045_s5 }
 0x181   : > { %p772_p11 = scmp.lt.u32.totalorder %s770_s11, %s766_s10  ;;  %p774_p13 = scmp.lt.u32.totalorder %s766_s10, %s993_s27 }
 0x182   : > { %p768_p7 = pnand %p767_p6, %p911_p4 }
 0x183   : > { %p773_p12 = por %p772_p11, %p771_p10 }
 0x184   : > { %p769_p9 = pneg %p768_p7 }
 0x185   : > { %p775_p0 = por %p774_p13, %p773_p12 }
 0x187   : > { %p776_p1 = pnand %p775_p0, %p769_p9 }
 0x189   : > { %779 = shalt.err (!%p776_p1)
}
 0x18a   : > { %684 = dma.vmem_to_hbm [thread:$0]  (%p911_p4), %s995_s17, 128, %s993_s27, %s487_s29  }
 0x18b PF: > { %p690_p2 = scmp.ge.s32.totalorder %s830_s23, 2  ;;  %s513_s14 = sand.u32 1, %s810_s18  }
 0x18c   : > { %s514_s24 = scalar_lea.sflag [#allocation3], %s513_s14 }
 0x18d   : > { %p687_p3 = pnand %p690_p2, %p918_p8 }
 0x18f   : > { %805 = dma.done.wait (!%p687_p3), %s514_s24, 128  }
 0x190   : > { %807 = vsyncadd (!%p687_p3), %s514_s24, 4294967168  ;;  %s18_s23 = sadd.s32 1, %s830_s23   ;;  %s1050_s18 = smov %s814_s19 }
 0x191   : > { %p15_p5 = scmp.ge.s32.totalorder %s18_s23, 4   ;;  %s1051_s19 = smov %s818_s20 }
 0x192   : > { %s1052_s20 = smov %s924_s6  ;;  %s1053_s21 = smov %s826_s22 }
 0x193   : > { %s1054_s22 = smov %s1056_s26  ;;  %17 = sbr.rel (!%p15_p5) target bundleno = 4 (0x4), region = 81 }
 0x19a   :  { %519 = vsyncpa [#allocation3], 1 }
 0x19b   :  { %521 = vsyncpa [#allocation3 + $0x1], 1 }

</bundles_post_ra>
